<compile_context>
chip_gen: v7x
topology: tpu7x:2x2x1
jax: 0.10.0
libtpu: 0.0.40
codegen_flags: <defaults>
</compile_context>

<pallas_src>
import functools

import jax
import jax.numpy as jnp
from jax.experimental import pallas as pl
from jax.experimental.pallas import tpu as pltpu


# Layer schedule: (name, kernel_size, padding, dilation) — order == kernel index.
_LAYERS = (
    ("b0_0", 3, 1, 1), ("b0_1", 3, 1, 1),
    ("b1_0", 1, 0, 1), ("b1_1", 3, 1, 1), ("b1_2", 3, 3, 3),
    ("b2_0", 1, 0, 1), ("b2_1", 3, 1, 1), ("b2_2", 3, 5, 5),
    ("cat", 3, 1, 1), ("res", 1, 0, 1),
)

_VMEM_LIMIT_BYTES = 48 * 1024 * 1024      # <= v7x 64 MiB physical, > all defaults
_VMEM_BUDGET_BYTES = 24 * 1024 * 1024     # target working set for B_blk selection


def _pad8(c):
    return -(-c // 8) * 8


def _unique_offsets():
    offs = set()
    for _, K, pad, dil in _LAYERS:
        for ky in range(K):
            for kx in range(K):
                dy, dx = ky * dil - pad, kx * dil - pad
                if (dy, dx) != (0, 0):
                    offs.add((dy, dx))
    return tuple(sorted(offs))


_OFFSETS = _unique_offsets()                       # 24 unique non-center taps
_OFF_INDEX = {o: i for i, o in enumerate(_OFFSETS)}


@functools.lru_cache(maxsize=None)
def _roll_is_jnp_convention() -> bool:
    """Check pltpu.roll's shift direction once on-device (documented = jnp.roll)."""
    def k(x_ref, o_ref):
        o_ref[...] = pltpu.roll(x_ref[...], 1, axis=1)

    x = jnp.arange(8 * 128, dtype=jnp.float32).reshape(8, 128)
    y = pl.pallas_call(k, out_shape=jax.ShapeDtypeStruct((8, 128), jnp.float32))(x)
    first = float(y[0, 0])
    if first == 127.0:
        return True      # out[i] = in[i - shift]  (jnp.roll convention)
    if first == 1.0:
        return False     # out[i] = in[i + shift]
    raise RuntimeError(f"unexpected pltpu.roll behaviour: y[0,0]={first}")


# ----------------------------------------------------------------------------
# Fused FeE kernel: one grid step == B_blk batch images, everything in VMEM.
# ----------------------------------------------------------------------------
def _fee_kernel(mask_ref, x_ref, *args, W, n_tot, roll_jnp, off_index):
    o_ref = args[-1]
    prm = args[:-1]                      # (w0, b0, w1, b1, ..., w9, b9)

    def shifted(x, dy, dx):
        """x[c, h+dy, w+dx] per output pixel; zero outside the (per-image) bounds."""
        if dy == 0 and dx == 0:
            return x
        s = dy * W + dx
        shift = (-s) % n_tot if roll_jnp else s % n_tot
        xs = pltpu.roll(x, shift=shift, axis=1)
        # Precomputed 0/1 boundary mask (also kills cross-image wrap), (1, n_tot).
        return xs * mask_ref[pl.ds(off_index[(dy, dx)], 1), :]

    def conv_bn(inputs, li):
        """BasicConv2d (conv + folded BN) as a single tap-stacked MXU matmul.

        inputs: list of (C_pad, n_tot) f32 maps forming the layer's input
        channel segments (for conv_cat this is [x0, x1, x2] — no concat layer).
        """
        _, K, pad, dil = _LAYERS[li]
        pieces = []
        for ky in range(K):
            for kx in range(K):
                dy, dx = ky * dil - pad, kx * dil - pad
                for xin in inputs:
                    pieces.append(shifted(xin, dy, dx))
        rhs = pieces[0] if len(pieces) == 1 else jnp.concatenate(pieces, axis=0)
        rhs = rhs.astype(jnp.bfloat16)                 # bf16 MXU operand
        w = prm[2 * li][...]                           # (Cout_pad, K*K*Cin_pad) bf16
        b = prm[2 * li + 1][...]                       # (Cout_pad, 1) f32
        return jnp.dot(w, rhs, preferred_element_type=jnp.float32) + b

    x = x_ref[0].astype(jnp.float32)                   # (Ci_pad, n_tot)

    x0 = conv_bn([conv_bn([x], 0)], 1)                              # branch0
    x1 = conv_bn([conv_bn([conv_bn([x], 2)], 3)], 4)                # branch1 (dil 3)
    x2 = conv_bn([conv_bn([conv_bn([x], 5)], 6)], 7)                # branch2 (dil 5)

    x_cat = conv_bn([x0, x1, x2], 8)                                # conv_cat (no concat)
    x_res = conv_bn([x], 9)                                         # conv_res
    o_ref[0] = jnp.maximum(x_cat + x_res, 0.0).astype(o_ref.dtype)


# ----------------------------------------------------------------------------
# Parameter folding (BN scale into weights, tap-stacked + channel-padded layout)
# ----------------------------------------------------------------------------
def _fold_layer(p, K, segments):
    """Fold BN scale into the conv weight and flatten to the tap-stacked layout.

    segments: list of (orig_channels, padded_channels) describing how this
    layer's input channels appear (zero-padded per segment) in the kernel RHS.
    Returns (w_flat bf16 (Cout_pad, K*K*sum_pad), bias f32 (Cout_pad, 1)).
    """
    w = p["w"].astype(jnp.float32)                          # HWIO: (K, K, Cin, Cout)
    cin, cout = w.shape[2], w.shape[3]
    assert sum(oc for oc, _ in segments) == cin
    cout_pad = _pad8(cout)
    sum_pad = sum(pc for _, pc in segments)

    wf = w * p["scale"][None, None, None, :]                # fold gamma/sqrt(var+eps)
    w_t = jnp.transpose(wf, (0, 1, 3, 2)).reshape(K * K, cout, cin)

    wp = jnp.zeros((K * K, cout_pad, sum_pad), jnp.float32)
    src = dst = 0
    for oc, pc in segments:
        wp = wp.at[:, :cout, dst:dst + oc].set(w_t[:, :, src:src + oc])
        src += oc
        dst += pc
    # Column order must match the kernel RHS: tap-major, then (padded) segment channels.
    w_flat = jnp.transpose(wp, (1, 0, 2)).reshape(cout_pad, K * K * sum_pad)
    bias = jnp.zeros((cout_pad,), jnp.float32).at[:cout].set(
        p["bias"].astype(jnp.float32)).reshape(cout_pad, 1)
    return w_flat.astype(jnp.bfloat16), bias


def fold_fee_params(params):
    """One-time prep of the Pallas kernel parameter layout (and roll probe)."""
    _roll_is_jnp_convention()                               # warm the probe eagerly
    in_channel = params["b0_0"]["w"].shape[2]
    out_channel = params["b0_0"]["w"].shape[3]
    seg_in = [(in_channel, _pad8(in_channel))]
    seg_out = [(out_channel, _pad8(out_channel))]
    segmap = {"b0_0": seg_in, "b0_1": seg_out,
              "b1_0": seg_in, "b1_1": seg_out, "b1_2": seg_out,
              "b2_0": seg_in, "b2_1": seg_out, "b2_2": seg_out,
              "cat": seg_out * 3, "res": seg_in}
    folded = {name: _fold_layer(params[name], K, segmap[name])
              for name, K, _, _ in _LAYERS}
    folded["meta"] = (in_channel, out_channel)
    return folded


# ----------------------------------------------------------------------------
# Host-side helpers
# ----------------------------------------------------------------------------
def _make_masks(H, W, b_blk):
    """(n_offsets, b_blk*H*W) f32 0/1 boundary masks, one row per unique tap."""
    hw = H * W
    lane = jnp.arange(hw, dtype=jnp.int32)
    hh = lane // W
    ww = lane - hh * W
    rows = []
    for dy, dx in _OFFSETS:
        rows.append((hh >= -dy) & (hh < H - dy) & (ww >= -dx) & (ww < W - dx))
    m = jnp.stack(rows, 0).astype(jnp.float32)              # (n_off, hw)
    return jnp.tile(m, (1, b_blk))                          # (n_off, b_blk*hw)


def _pick_batch_block(n, bytes_per_image, budget_bytes):
    """Largest divisor of n fitting the VMEM budget while keeping >=2 grid steps."""
    best = 1
    for b in range(1, n + 1):
        if n % b:
            continue
        if n >= 2 and n // b < 2:       # keep both v7x TensorCores busy
            continue
        if b * bytes_per_image > budget_bytes:
            continue
        best = b
    return best


# ----------------------------------------------------------------------------
# Forward wrapper
# ----------------------------------------------------------------------------
def fee_forward(x_nchw, kparams):
    """FeE forward. x_nchw: (N, Cin, H, W); kparams from fold_fee_params."""
    N, Ci, H, W = x_nchw.shape
    hw = H * W
    _, out_channel = kparams["meta"]
    ci_pad = _pad8(Ci)
    cout_pad = kparams["res"][0].shape[0]

    # Rough per-image resident footprint (f32 rows * hw * 4B): input, branch
    # outputs, largest stacked RHS (+bf16 copy), double-buffered I/O blocks.
    bytes_per_image = (3 * ci_pad + 48 * cout_pad) * hw * 4
    b_blk = _pick_batch_block(N, bytes_per_image, _VMEM_BUDGET_BYTES)
    G = N // b_blk
    n_tot = b_blk * hw

    # NCHW -> (G, Cpad, B_blk*H*W): channels on sublanes, pixels (all images of
    # the block back-to-back) on lanes.  Pure layout plumbing, done once in XLA.
    x = x_nchw.reshape(N, Ci, hw).astype(jnp.float32)
    if ci_pad != Ci:
        x = jnp.pad(x, ((0, 0), (0, ci_pad - Ci), (0, 0)))
    xg = (x.reshape(G, b_blk, ci_pad, hw)
            .transpose(0, 2, 1, 3)
            .reshape(G, ci_pad, n_tot))

    masks = _make_masks(H, W, b_blk)                        # (n_off, n_tot)

    inputs = [masks, xg]
    in_specs = [pl.BlockSpec(masks.shape, lambda b: (0, 0)),
                pl.BlockSpec((1, ci_pad, n_tot), lambda b: (b, 0, 0))]
    for name, _, _, _ in _LAYERS:
        w_k, b_k = kparams[name]
        inputs += [w_k, b_k]
        # Grid-invariant blocks: fetched once, kept resident across grid steps.
        in_specs += [pl.BlockSpec(w_k.shape, lambda b: (0, 0)),
                     pl.BlockSpec(b_k.shape, lambda b: (0, 0))]

    kern = functools.partial(_fee_kernel, W=W, n_tot=n_tot,
                             roll_jnp=_roll_is_jnp_convention(),
                             off_index=_OFF_INDEX)
    outg = pl.pallas_call(
        kern,
        out_shape=jax.ShapeDtypeStruct((G, cout_pad, n_tot), jnp.float32),
        grid=(G,),
        in_specs=in_specs,
        out_specs=pl.BlockSpec((1, cout_pad, n_tot), lambda b: (b, 0, 0)),
        compiler_params=pltpu.CompilerParams(
            dimension_semantics=("parallel",),
            vmem_limit_bytes=_VMEM_LIMIT_BYTES),
    )(*inputs)

    out = (outg.reshape(G, cout_pad, b_blk, hw)
               .transpose(0, 2, 1, 3)
               .reshape(N, cout_pad, hw)[:, :out_channel]
               .reshape(N, out_channel, H, W))
    return out.astype(x_nchw.dtype)


# ----------------------------------------------------------------------------
# Parameter construction (deterministic, mirrors module __init__ shapes)
# ----------------------------------------------------------------------------
def make_basic_conv_params(key, cin, cout, k):
    kw, kg, kb, km, kv = jax.random.split(key, 5)
    fan_in = cin * k * k
    bound = 1.0 / jnp.sqrt(jnp.float32(fan_in))
    # Conv weight stored HWIO = (KH, KW, Cin, Cout).
    w = jax.random.uniform(kw, (k, k, cin, cout), jnp.float32, -bound, bound)
    # BatchNorm2d (eval mode) parameters / running stats, randomized but fixed.
    gamma = jax.random.uniform(kg, (cout,), jnp.float32, 0.5, 1.5)
    beta = jax.random.uniform(kb, (cout,), jnp.float32, -0.5, 0.5)
    mean = jax.random.uniform(km, (cout,), jnp.float32, -0.5, 0.5)
    var = jax.random.uniform(kv, (cout,), jnp.float32, 0.5, 1.5)
    eps = 1e-5
    scale = gamma / jnp.sqrt(var + eps)
    bias = beta - mean * scale
    return dict(w=w, scale=scale, bias=bias)


def make_fee_params(key, in_channel, out_channel):
    keys = jax.random.split(key, 10)
    cins = {"b0_0": in_channel, "b0_1": out_channel,
            "b1_0": in_channel, "b1_1": out_channel, "b1_2": out_channel,
            "b2_0": in_channel, "b2_1": out_channel, "b2_2": out_channel,
            "cat": 3 * out_channel, "res": in_channel}
    return {name: make_basic_conv_params(keys[i], cins[name], out_channel, K)
            for i, (name, K, _, _) in enumerate(_LAYERS)}


# ----------------------------------------------------------------------------
# Pure-JAX (XLA) reference for verification.  mm_dtype selects the matmul
# operand precision so we can check both (a) exact structural agreement with
# the kernel's bf16-operand/f32-accumulate math and (b) closeness to full f32.
# ----------------------------------------------------------------------------
def _ref_conv_bn(x_nchw, p, padding, dilation=1, mm_dtype=jnp.float32):
    w = (p["w"] * p["scale"][None, None, None, :]).astype(mm_dtype)   # folded BN
    w_oihw = jnp.transpose(w, (3, 2, 0, 1))
    y = jax.lax.conv_general_dilated(
        x_nchw.astype(mm_dtype), w_oihw, window_strides=(1, 1),
        padding=[(padding, padding), (padding, padding)],
        rhs_dilation=(dilation, dilation),
        dimension_numbers=("NCHW", "OIHW", "NCHW"),
        preferred_element_type=jnp.float32,
    )
    return y + p["bias"][None, :, None, None]


def fee_forward_ref(x_nchw, params, mm_dtype=jnp.float32):
    bc = functools.partial(_ref_conv_bn, mm_dtype=mm_dtype)
    x0 = bc(bc(x_nchw, params["b0_0"], 1), params["b0_1"], 1)
    x1 = bc(bc(bc(x_nchw, params["b1_0"], 0), params["b1_1"], 1),
            params["b1_2"], 3, dilation=3)
    x2 = bc(bc(bc(x_nchw, params["b2_0"], 0), params["b2_1"], 1),
            params["b2_2"], 5, dilation=5)
    x_cat = bc(jnp.concatenate([x0, x1, x2], axis=1), params["cat"], 1)
    x_res = bc(x_nchw, params["res"], 0)
    return jnp.maximum(x_cat + x_res, 0.0)


# ----------------------------------------------------------------------------
if __name__ == "__main__":
    key = jax.random.PRNGKey(0)
    k_params, k_x = jax.random.split(key)

    batch, in_channel, out_channel, spatial = 2, 4, 8, 16
    params = make_fee_params(k_params, in_channel, out_channel)
    x = jax.random.normal(k_x, (batch, in_channel, spatial, spatial), jnp.float32)

    kparams = fold_fee_params(params)
    out = jax.block_until_ready(fee_forward(x, kparams))

    # (a) Tight check vs. an XLA reference using the same bf16-operand /
    #     f32-accumulate math (differences = summation order only).
    ref_matched = jax.block_until_ready(fee_forward_ref(x, params, jnp.bfloat16))
    # (b) Loose sanity check vs. the full-f32 reference (PyTorch semantics).
    ref_f32 = jax.block_until_ready(fee_forward_ref(x, params, jnp.float32))

    assert out.shape == (batch, out_channel, spatial, spatial), out.shape
    err_matched = float(jnp.max(jnp.abs(out - ref_matched)))
    err_f32 = float(jnp.max(jnp.abs(out - ref_f32)))
    assert jnp.allclose(out, ref_matched, rtol=5e-3, atol=5e-3), err_matched
    assert jnp.allclose(out, ref_f32, rtol=5e-2, atol=5e-2), err_f32
    print("KERNEL_OK")
</pallas_src>

<mosaic_0001>
module attributes {stable_mosaic.version = 11 : i64} {
  func.func @k(%arg0: memref<8x128xf32, #tpu.memory_space<vmem>>, %arg1: memref<8x128xf32, #tpu.memory_space<vmem>>) attributes {dimension_semantics = [], scalar_prefetch = 0 : i64, scratch_operands = 0 : i64, tpu.core_type = #tpu.core_type<tc>} {
    %c0 = arith.constant 0 : index
    %c0_0 = arith.constant 0 : index
    %0 = vector.load %arg0[%c0, %c0_0] : memref<8x128xf32, #tpu.memory_space<vmem>>, vector<8x128xf32>
    %c1_i32 = arith.constant 1 : i32
    %1 = tpu.dynamic_rotate %0 by %c1_i32 dim 1 : vector<8x128xf32>, i32 -> vector<8x128xf32>
    %c0_1 = arith.constant 0 : index
    %c0_2 = arith.constant 0 : index
    %2 = vector.load %arg1[%c0_1, %c0_2] : memref<8x128xf32, #tpu.memory_space<vmem>>, vector<8x128xf32>
    tpu.vector_store %arg1[%c0_1, %c0_2], %1 {strides = array<i32>} : memref<8x128xf32, #tpu.memory_space<vmem>>, vector<8x128xf32>,
    return
  }
}

</mosaic_0001>

<bundles_post_ra>
// kernel: tpu_custom_call.1
= control target key start
LH: loop header
LB: loop body
LE: loop exit
PB: predicated region body
PF: predicated region fallthrough
CT: control target
= control target key end

     0   :  { %6 = vsyncpa [#allocation3], 0  ;;  %s128_s0 = inlined_call_operand.hbm [shape: f32[8,128], index: 0, kind: input, shape index: {}]   ;;  %s129_s1 = inlined_call_operand.hbm [shape: f32[8,128], index: 1, kind: output, shape index: {}]  }
   0x1   :  { %7 = vsyncpa [#allocation4], 0  ;;  %s91_s6 = smov [#allocation2]   ;;  %s43_s10 = scalar_lea.hbm %s128_s0, 128 }
   0x2   :  { %s14_s7 = sshll.u32 %s91_s6, 4  ;;  %p44_p0 = scmp.ne.s32.totalorder %s128_s0, %s43_s10  ;;  %s15_s7 = int_to_ptr.vmem [resolvable:$true] %s14_s7 }
   0x3   :  { %p47_p1 = scmp.lt.u32.totalorder %s43_s10, %s128_s0 }
   0x5   :  { %p49_p2 = pnand %p47_p1, %p44_p0 }
   0x7   :  { %52 = shalt.err (!%p49_p2)
}
   0x8   :  { %s53_s15 = scalar_lea.vmem %s15_s7, 128  ;;  %p58_p4 = scmp.lt.s32.totalorder %s15_s7, %s15_s7 }
   0x9   :  { %p54_p3 = scmp.ne.s32.totalorder %s15_s7, %s53_s15  ;;  %p59_p5 = scmp.lt.s32.totalorder %s53_s15, %s53_s15 }
   0xb   :  { %p60_p6 = por %p59_p5, %p58_p4 }
   0xd   :  { %p61_p7 = pnand %p60_p6, %p54_p3 }
   0xf   :  { %64 = shalt.err (!%p61_p7)
}
  0x10   :  { %17 = dma.hbm_to_vmem [thread:$0]  %s128_s0, 128, %s15_s7, [#allocation3]  }
  0x11   :  { %87 = dma.done.wait [#allocation3], 128  }
  0x12   :  { %88 = vsyncadd [#allocation3], 4294967168  ;;  %v21_v0 = vld [vmem:[#allocation2] sm:$0xff]  ;;  %s92_s18 = smov 1   ;;  %s93_s19 = smov [#allocation5]  }
  0x13   :  { %22 = vrot.lane.b32.xlu0 %v21_v0, %s92_s18  ;;  %s31_s20 = sshll.u32 %s93_s19, 4  ;;  %s32_s20 = int_to_ptr.vmem [resolvable:$true] %s31_s20 }
  0x14   :  { %s65_s21 = scalar_lea.vmem %s32_s20, 128  ;;  %p70_p9 = scmp.lt.s32.totalorder %s32_s20, %s32_s20 }
  0x15   :  { %p66_p8 = scmp.ne.s32.totalorder %s32_s20, %s65_s21  ;;  %p71_p10 = scmp.lt.s32.totalorder %s65_s21, %s65_s21 }
  0x17   :  { %p72_p11 = por %p71_p10, %p70_p9 }
  0x19   :  { %p73_p12 = pnand %p72_p11, %p66_p8 }
  0x85   :  { %v23_v1 = vpop.permute.xlu0 %22 }
  0x86   :  { %24 = vst [vmem:[#allocation5] sm:$0xff] %v23_v1 }
  0x87   :  { %76 = shalt.err (!%p73_p12)
}
  0x88   :  { %s77_s0 = scalar_lea.hbm %s129_s1, 128 }
  0x89   :  { %p78_p13 = scmp.ne.s32.totalorder %s129_s1, %s77_s0  ;;  %p81_p0 = scmp.lt.u32.totalorder %s77_s0, %s129_s1 }
  0x8b   :  { %p83_p1 = pnand %p81_p0, %p78_p13 }
  0x8d   :  { %86 = shalt.err (!%p83_p1)
}
  0x8e   :  { %34 = dma.vmem_to_hbm [thread:$0]  %s32_s20, 128, %s129_s1, [#allocation4]  }
  0x8f   :  { %89 = dma.done.wait [#allocation4], 128  }
  0x90   :  { %90 = vsyncadd [#allocation4], 4294967168 }
  0x91   :  { %38 = vsyncpa [#allocation3], 1 }
  0x92   :  { %39 = vsyncpa [#allocation4], 1 }

</bundles_post_ra>
